<compile_context>
chip_gen: v7x
topology: tpu7x:2x2x1
jax: 0.10.0
libtpu: 0.0.40
codegen_flags: <defaults>
</compile_context>

<pallas_src>
import functools

import jax
import jax.numpy as jnp
from jax import lax
from jax.experimental import pallas as pl
from jax.experimental.pallas import tpu as pltpu


def _round_up(x, m):
    return ((x + m - 1) // m) * m


def _num_tensorcores():
    """Best-effort TensorCores-per-device (2 on v4/v5p megacore and v7x, else 1)."""
    try:
        kind = jax.devices()[0].device_kind.lower()
    except Exception:
        return 1
    for tag in ("v4", "v5p", "v7", "7x"):
        if tag in kind:
            return 2
    return 1


def _vmem_limit_bytes():
    """Generation-aware VMEM limit: ~half of physical, capped at 64 MiB."""
    try:
        cap = int(pltpu.get_tpu_info().vmem_capacity_bytes)
    except Exception:
        cap = 128 * 1024 * 1024
    return max(16 * 1024 * 1024, min(cap // 2, 64 * 1024 * 1024))


# ---------------------------------- kernel ----------------------------------
def _combined_loss_kernel(pred_ref, target_ref, recon_ref, edge_ref, *,
                          nb, hp, wp, h, w, inner, n_valid,
                          fix_rows, fix_cols, gate_tail):
    j = pl.program_id(1)

    @pl.when(j == 0)
    def _():
        recon_ref[...] = jnp.zeros_like(recon_ref)
        edge_ref[...] = jnp.zeros_like(edge_ref)

    def _compute():
        pred = pred_ref[...].astype(jnp.float32)
        tgt = target_ref[...].astype(jnp.float32)

        # Index planes built once per step at (1, hp, wp) -- 1/nb of a block,
        # NOT per-image full-block iotas.
        row = lax.broadcasted_iota(jnp.int32, (1, hp, wp), 1)
        col = lax.broadcasted_iota(jnp.int32, (1, hp, wp), 2)

        def sobel(x):
            # 6-roll separable Sobel (cross-correlation, zero padding).
            # Zero boundary comes either from real pad rows/cols (unaligned
            # dims) or from the border corrections below (exactly aligned dims).
            a = pltpu.roll(x, shift=wp - 1, axis=2)        # x[:, i, j+1]
            b = pltpu.roll(x, shift=1, axis=2)             # x[:, i, j-1]
            if fix_cols:                                   # W == Wp: kill wrap
                a = jnp.where(col < wp - 1, a, 0.0)        # right border -> 0
                b = jnp.where(col > 0, b, 0.0)             # left  border -> 0
            dcol = a - b                                   # x(j+1) - x(j-1)
            hsum = a + 2.0 * x + b                         # x(j+1)+2x+x(j-1)
            d_up = pltpu.roll(dcol, shift=1, axis=1)       # dcol[i-1]
            d_dn = pltpu.roll(dcol, shift=hp - 1, axis=1)  # dcol[i+1]
            h_up = pltpu.roll(hsum, shift=1, axis=1)       # hsum[i-1]
            h_dn = pltpu.roll(hsum, shift=hp - 1, axis=1)  # hsum[i+1]
            if fix_rows:                                   # H == Hp: kill wrap
                d_up = jnp.where(row > 0, d_up, 0.0)
                h_up = jnp.where(row > 0, h_up, 0.0)
                d_dn = jnp.where(row < hp - 1, d_dn, 0.0)
                h_dn = jnp.where(row < hp - 1, h_dn, 0.0)
            gx = d_up + 2.0 * dcol + d_dn
            gy = h_dn - h_up
            return jnp.sqrt(gx * gx + gy * gy + 1e-6)

        def fold(t):
            # (nb, hp, wp) -> (1, 8, wp): layout-preserving reshape (split rows
            # at the sublane-tile boundary, merge with batch) + leading-axis sum
            # == pure elementwise vreg adds.  Keeps accumulators tiny.
            return jnp.sum(t.reshape(nb * (hp // 8), 8, wp), axis=0)[None]

        # Reconstruction (MSE) partial sums: pad rows/cols/images are 0 in both
        # inputs -> their difference is 0, no masking needed.
        d = pred - tgt
        recon_ref[...] += fold(d * d)

        # Edge partial sums: mask the pad fringe (its Sobel values are garbage)
        # only when something is actually padded.
        ed = sobel(pred) - sobel(tgt)
        if (hp > h) or (wp > w):
            if (hp > h) and (wp > w):
                valid = (row < h) & (col < w)
            elif hp > h:
                valid = row < h
            else:
                valid = col < w
            ed = jnp.where(valid, ed, 0.0)
        edge_ref[...] += fold(ed * ed)

    if gate_tail:
        blk = pl.program_id(0) * inner + pl.program_id(1)

        @pl.when(blk * nb < n_valid)   # skip compute on fully zero-padded blocks
        def _():
            _compute()
    else:
        _compute()


# ---------------------------------- wrapper ----------------------------------
def combined_loss(pred, target, edge_weight=0.1):
    """pred/target: (N, 1, H, W).  loss = MSE + edge_weight * MSE(sobel, sobel)."""
    assert pred.shape == target.shape
    N, C, H, W = pred.shape
    assert C == 1, "SobelFilter in the reference module expects single-channel images"

    # Keep bf16/f32 through the DMA; anything else is cast to f32 in the wrapper.
    if pred.dtype in (jnp.float32, jnp.bfloat16):
        dtype = jnp.dtype(pred.dtype)
    else:
        dtype = jnp.dtype(jnp.float32)
    pred3 = pred.reshape(N, H, W).astype(dtype)
    target3 = target.reshape(N, H, W).astype(dtype)

    row_align = 16 if dtype == jnp.bfloat16 else 8
    Hp = _round_up(H, row_align)
    Wp = _round_up(W, 128)

    vmem_limit = _vmem_limit_bytes()
    target_block_bytes = max(1 << 20, vmem_limit // 16)   # inputs are double-buffered
    img_bytes = Hp * Wp * dtype.itemsize
    nb = max(1, min(N, target_block_bytes // max(1, img_bytes)))

    blocks = -(-N // nb)                                   # ceil(N / nb)
    outer = _num_tensorcores()
    if outer > 1 and blocks < 2:
        outer = 1                                          # nothing to split
    inner = -(-blocks // outer)
    n_pad = outer * inner * nb

    # Pad only if actually needed (aligned inputs avoid the extra HBM round trip).
    if (n_pad != N) or (Hp != H) or (Wp != W):
        pad_cfg = ((0, n_pad - N), (0, Hp - H), (0, Wp - W))
        pred3 = jnp.pad(pred3, pad_cfg)
        target3 = jnp.pad(target3, pad_cfg)

    kernel = functools.partial(
        _combined_loss_kernel,
        nb=nb, hp=Hp, wp=Wp, h=H, w=W, inner=inner, n_valid=N,
        fix_rows=(Hp == H), fix_cols=(Wp == W),
        gate_tail=(outer * inner > blocks))

    in_map = lambda i, j: (i * inner + j, 0, 0)   # noqa: E731
    out_map = lambda i, j: (i, 0, 0)              # noqa: E731

    recon_sse, edge_sse = pl.pallas_call(
        kernel,
        out_shape=(
            jax.ShapeDtypeStruct((outer, 8, Wp), jnp.float32),
            jax.ShapeDtypeStruct((outer, 8, Wp), jnp.float32),
        ),
        grid_spec=pltpu.PrefetchScalarGridSpec(
            num_scalar_prefetch=0,
            grid=(outer, inner),
            in_specs=[
                pl.BlockSpec((nb, Hp, Wp), in_map),
                pl.BlockSpec((nb, Hp, Wp), in_map),
            ],
            out_specs=[
                pl.BlockSpec((1, 8, Wp), out_map),
                pl.BlockSpec((1, 8, Wp), out_map),
            ],
        ),
        compiler_params=pltpu.CompilerParams(
            dimension_semantics=("parallel", "arbitrary"),
            vmem_limit_bytes=vmem_limit,
        ),
    )(pred3, target3)

    inv_count = 1.0 / float(N * H * W)            # ORIGINAL element count
    recon = jnp.sum(recon_sse) * inv_count
    edge = jnp.sum(edge_sse) * inv_count
    return recon + edge_weight * edge


# ---------------------- pure-JAX reference (matches PyTorch) ----------------
def _reference_loss(pred, target, edge_weight=0.1):
    def sobel_mag(img):  # (N, 1, H, W)
        x = img[:, 0]
        H, W = x.shape[1], x.shape[2]
        p = jnp.pad(x, ((0, 0), (1, 1), (1, 1)))
        tl = p[:, 0:H, 0:W]; tc = p[:, 0:H, 1:W + 1]; tr = p[:, 0:H, 2:W + 2]
        ml = p[:, 1:H + 1, 0:W]; mr = p[:, 1:H + 1, 2:W + 2]
        bl = p[:, 2:H + 2, 0:W]; bc = p[:, 2:H + 2, 1:W + 1]; br = p[:, 2:H + 2, 2:W + 2]
        gx = (tr - tl) + 2.0 * (mr - ml) + (br - bl)
        gy = (bl - tl) + 2.0 * (bc - tc) + (br - tr)
        return jnp.sqrt(gx * gx + gy * gy + 1e-6)

    recon = jnp.mean((pred - target) ** 2)
    edge = jnp.mean((sobel_mag(pred) - sobel_mag(target)) ** 2)
    return recon + edge_weight * edge


if __name__ == "__main__":
    key = jax.random.PRNGKey(0)
    k1, k2, k3, k4, k5, k6 = jax.random.split(key, 6)

    # 1) Small canonical case: H aligned (border fix in rows), W padded (masked).
    pred1 = jax.random.normal(k1, (2, 1, 16, 16), dtype=jnp.float32)
    tgt1 = jax.random.normal(k2, (2, 1, 16, 16), dtype=jnp.float32)
    loss1 = jax.block_until_ready(combined_loss(pred1, tgt1, edge_weight=0.1))
    ref1 = _reference_loss(pred1, tgt1, edge_weight=0.1)
    assert jnp.allclose(loss1, ref1, rtol=1e-5, atol=1e-5), (loss1, ref1)

    # 2) Unaligned spatial dims in both directions (pure pad + mask path).
    pred2 = jax.random.normal(k3, (3, 1, 20, 40), dtype=jnp.float32)
    tgt2 = jax.random.normal(k4, (3, 1, 20, 40), dtype=jnp.float32)
    loss2 = jax.block_until_ready(combined_loss(pred2, tgt2, edge_weight=0.25))
    ref2 = _reference_loss(pred2, tgt2, edge_weight=0.25)
    assert jnp.allclose(loss2, ref2, rtol=1e-5, atol=1e-5), (loss2, ref2)

    # 3) Fully lane/sublane-aligned dims: no padding, no wrapper copy, in-kernel
    #    border corrections in both directions.
    pred3_ = jax.random.normal(k5, (2, 1, 8, 128), dtype=jnp.float32)
    tgt3_ = jax.random.normal(k6, (2, 1, 8, 128), dtype=jnp.float32)
    loss3 = jax.block_until_ready(combined_loss(pred3_, tgt3_, edge_weight=0.1))
    ref3 = _reference_loss(pred3_, tgt3_, edge_weight=0.1)
    assert jnp.allclose(loss3, ref3, rtol=1e-5, atol=1e-5), (loss3, ref3)

    # 4) bf16 inputs stay bf16 through the DMA and are upcast inside the kernel.
    pred4 = pred1.astype(jnp.bfloat16)
    tgt4 = tgt1.astype(jnp.bfloat16)
    loss4 = jax.block_until_ready(combined_loss(pred4, tgt4, edge_weight=0.1))
    ref4 = _reference_loss(pred4.astype(jnp.float32), tgt4.astype(jnp.float32),
                           edge_weight=0.1)
    assert jnp.allclose(loss4, ref4, rtol=1e-4, atol=1e-4), (loss4, ref4)

    print("KERNEL_OK")
</pallas_src>

<mosaic_0001>
module attributes {stable_mosaic.version = 11 : i64} {
  func.func @_combined_loss_kernel(%arg0: i32, %arg1: i32, %arg2: memref<2x16x128xf32, #tpu.memory_space<vmem>>, %arg3: memref<2x16x128xf32, #tpu.memory_space<vmem>>, %arg4: memref<1x8x128xf32, #tpu.memory_space<vmem>>, %arg5: memref<1x8x128xf32, #tpu.memory_space<vmem>>) attributes {dimension_semantics = [#tpu.dimension_semantics<parallel>, #tpu.dimension_semantics<arbitrary>], iteration_bounds = array<i64: 1, 1>, scalar_prefetch = 0 : i64, scratch_operands = 0 : i64, tpu.core_type = #tpu.core_type<tc>, window_params = [{transform_indices = @transform_0, window_bounds = array<i64: 2, 16, 128>}, {transform_indices = @transform_1, window_bounds = array<i64: 2, 16, 128>}, {transform_indices = @transform_2, window_bounds = array<i64: 1, 8, 128>}, {transform_indices = @transform_3, window_bounds = array<i64: 1, 8, 128>}]} {
    %c0_i32 = arith.constant 0 : i32
    %0 = arith.cmpi eq, %arg1, %c0_i32 : i32
    %1 = arith.extui %0 : i1 to i32
    %c0_i32_0 = arith.constant 0 : i32
    %2 = arith.cmpi ne, %1, %c0_i32_0 : i32
    scf.if %2 {
      %cst_51 = arith.constant 0.000000e+00 : f32
      %121 = vector.broadcast %cst_51 : f32 to vector<1x8x128xf32>
      %c0_52 = arith.constant 0 : index
      %c0_53 = arith.constant 0 : index
      %c0_54 = arith.constant 0 : index
      %122 = vector.load %arg4[%c0_52, %c0_53, %c0_54] : memref<1x8x128xf32, #tpu.memory_space<vmem>>, vector<1x8x128xf32>
      tpu.vector_store %arg4[%c0_52, %c0_53, %c0_54], %121 {strides = array<i32>} : memref<1x8x128xf32, #tpu.memory_space<vmem>>, vector<1x8x128xf32>,
      %cst_55 = arith.constant 0.000000e+00 : f32
      %123 = vector.broadcast %cst_55 : f32 to vector<1x8x128xf32>
      %c0_56 = arith.constant 0 : index
      %c0_57 = arith.constant 0 : index
      %c0_58 = arith.constant 0 : index
      %124 = vector.load %arg5[%c0_56, %c0_57, %c0_58] : memref<1x8x128xf32, #tpu.memory_space<vmem>>, vector<1x8x128xf32>
      tpu.vector_store %arg5[%c0_56, %c0_57, %c0_58], %123 {strides = array<i32>} : memref<1x8x128xf32, #tpu.memory_space<vmem>>, vector<1x8x128xf32>,
    } else {
    }
    %c0 = arith.constant 0 : index
    %c0_1 = arith.constant 0 : index
    %c0_2 = arith.constant 0 : index
    %3 = vector.load %arg2[%c0, %c0_1, %c0_2] : memref<2x16x128xf32, #tpu.memory_space<vmem>>, vector<2x16x128xf32>
    %c0_3 = arith.constant 0 : index
    %c0_4 = arith.constant 0 : index
    %c0_5 = arith.constant 0 : index
    %4 = vector.load %arg3[%c0_3, %c0_4, %c0_5] : memref<2x16x128xf32, #tpu.memory_space<vmem>>, vector<2x16x128xf32>
    %5 = tpu.iota {dimensions = array<i32: 1>} : vector<1x16x128xi32>
    %6 = tpu.iota {dimensions = array<i32: 2>} : vector<1x16x128xi32>
    %7 = arith.subf %3, %4 : vector<2x16x128xf32>
    %c0_6 = arith.constant 0 : index
    %c0_7 = arith.constant 0 : index
    %c0_8 = arith.constant 0 : index
    %8 = vector.load %arg4[%c0_6, %c0_7, %c0_8] : memref<1x8x128xf32, #tpu.memory_space<vmem>>, vector<1x8x128xf32>
    %9 = arith.mulf %7, %7 : vector<2x16x128xf32>
    %10 = vector.shape_cast %9 : vector<2x16x128xf32> to vector<4x8x128xf32>
    %cst = arith.constant dense<0.000000e+00> : vector<8x128xf32>
    %11 = vector.multi_reduction <add>, %10, %cst [0] : vector<4x8x128xf32> to vector<8x128xf32>
    %12 = vector.shape_cast %11 : vector<8x128xf32> to vector<1x8x128xf32>
    %13 = arith.addf %8, %12 : vector<1x8x128xf32>
    %c0_9 = arith.constant 0 : index
    %c0_10 = arith.constant 0 : index
    %c0_11 = arith.constant 0 : index
    %14 = vector.load %arg4[%c0_9, %c0_10, %c0_11] : memref<1x8x128xf32, #tpu.memory_space<vmem>>, vector<1x8x128xf32>
    tpu.vector_store %arg4[%c0_9, %c0_10, %c0_11], %13 {strides = array<i32>} : memref<1x8x128xf32, #tpu.memory_space<vmem>>, vector<1x8x128xf32>,
    %c127_i32 = arith.constant 127 : i32
    %15 = tpu.dynamic_rotate %3 by %c127_i32 dim 2 : vector<2x16x128xf32>, i32 -> vector<2x16x128xf32>
    %c1_i32 = arith.constant 1 : i32
    %16 = tpu.dynamic_rotate %3 by %c1_i32 dim 2 : vector<2x16x128xf32>, i32 -> vector<2x16x128xf32>
    %17 = arith.subf %15, %16 : vector<2x16x128xf32>
    %cst_12 = arith.constant 2.000000e+00 : f32
    %18 = vector.broadcast %cst_12 : f32 to vector<2x16x128xf32>
    %19 = arith.mulf %18, %3 : vector<2x16x128xf32>
    %20 = arith.addf %15, %19 : vector<2x16x128xf32>
    %21 = arith.addf %20, %16 : vector<2x16x128xf32>
    %c1_i32_13 = arith.constant 1 : i32
    %22 = tpu.dynamic_rotate %17 by %c1_i32_13 dim 1 : vector<2x16x128xf32>, i32 -> vector<2x16x128xf32>
    %c15_i32 = arith.constant 15 : i32
    %23 = tpu.dynamic_rotate %17 by %c15_i32 dim 1 : vector<2x16x128xf32>, i32 -> vector<2x16x128xf32>
    %c1_i32_14 = arith.constant 1 : i32
    %24 = tpu.dynamic_rotate %21 by %c1_i32_14 dim 1 : vector<2x16x128xf32>, i32 -> vector<2x16x128xf32>
    %c15_i32_15 = arith.constant 15 : i32
    %25 = tpu.dynamic_rotate %21 by %c15_i32_15 dim 1 : vector<2x16x128xf32>, i32 -> vector<2x16x128xf32>
    %c0_i32_16 = arith.constant 0 : i32
    %26 = vector.broadcast %c0_i32_16 : i32 to vector<1x16x128xi32>
    %27 = arith.cmpi sgt, %5, %26 : vector<1x16x128xi32>
    %cst_17 = arith.constant 0.000000e+00 : f32
    %28 = vector.shape_cast %27 : vector<1x16x128xi1> to vector<1x16x128xi1>
    %29 = vector.broadcast %28 : vector<1x16x128xi1> to vector<2x16x128xi1>
    %30 = vector.broadcast %cst_17 : f32 to vector<2x16x128xf32>
    %31 = arith.select %29, %22, %30 : vector<2x16x128xi1>, vector<2x16x128xf32>
    %c0_i32_18 = arith.constant 0 : i32
    %32 = vector.broadcast %c0_i32_18 : i32 to vector<1x16x128xi32>
    %33 = arith.cmpi sgt, %5, %32 : vector<1x16x128xi32>
    %cst_19 = arith.constant 0.000000e+00 : f32
    %34 = vector.shape_cast %33 : vector<1x16x128xi1> to vector<1x16x128xi1>
    %35 = vector.broadcast %34 : vector<1x16x128xi1> to vector<2x16x128xi1>
    %36 = vector.broadcast %cst_19 : f32 to vector<2x16x128xf32>
    %37 = arith.select %35, %24, %36 : vector<2x16x128xi1>, vector<2x16x128xf32>
    %c15_i32_20 = arith.constant 15 : i32
    %38 = vector.broadcast %c15_i32_20 : i32 to vector<1x16x128xi32>
    %39 = arith.cmpi slt, %5, %38 : vector<1x16x128xi32>
    %cst_21 = arith.constant 0.000000e+00 : f32
    %40 = vector.shape_cast %39 : vector<1x16x128xi1> to vector<1x16x128xi1>
    %41 = vector.broadcast %40 : vector<1x16x128xi1> to vector<2x16x128xi1>
    %42 = vector.broadcast %cst_21 : f32 to vector<2x16x128xf32>
    %43 = arith.select %41, %23, %42 : vector<2x16x128xi1>, vector<2x16x128xf32>
    %c15_i32_22 = arith.constant 15 : i32
    %44 = vector.broadcast %c15_i32_22 : i32 to vector<1x16x128xi32>
    %45 = arith.cmpi slt, %5, %44 : vector<1x16x128xi32>
    %cst_23 = arith.constant 0.000000e+00 : f32
    %46 = vector.shape_cast %45 : vector<1x16x128xi1> to vector<1x16x128xi1>
    %47 = vector.broadcast %46 : vector<1x16x128xi1> to vector<2x16x128xi1>
    %48 = vector.broadcast %cst_23 : f32 to vector<2x16x128xf32>
    %49 = arith.select %47, %25, %48 : vector<2x16x128xi1>, vector<2x16x128xf32>
    %cst_24 = arith.constant 2.000000e+00 : f32
    %50 = vector.broadcast %cst_24 : f32 to vector<2x16x128xf32>
    %51 = arith.mulf %50, %17 : vector<2x16x128xf32>
    %52 = arith.addf %31, %51 : vector<2x16x128xf32>
    %53 = arith.addf %52, %43 : vector<2x16x128xf32>
    %54 = arith.subf %49, %37 : vector<2x16x128xf32>
    %55 = arith.mulf %53, %53 : vector<2x16x128xf32>
    %56 = arith.mulf %54, %54 : vector<2x16x128xf32>
    %57 = arith.addf %55, %56 : vector<2x16x128xf32>
    %cst_25 = arith.constant 9.99999997E-7 : f32
    %58 = vector.broadcast %cst_25 : f32 to vector<2x16x128xf32>
    %59 = arith.addf %57, %58 : vector<2x16x128xf32>
    %60 = math.sqrt %59 : vector<2x16x128xf32>
    %c127_i32_26 = arith.constant 127 : i32
    %61 = tpu.dynamic_rotate %4 by %c127_i32_26 dim 2 : vector<2x16x128xf32>, i32 -> vector<2x16x128xf32>
    %c1_i32_27 = arith.constant 1 : i32
    %62 = tpu.dynamic_rotate %4 by %c1_i32_27 dim 2 : vector<2x16x128xf32>, i32 -> vector<2x16x128xf32>
    %63 = arith.subf %61, %62 : vector<2x16x128xf32>
    %cst_28 = arith.constant 2.000000e+00 : f32
    %64 = vector.broadcast %cst_28 : f32 to vector<2x16x128xf32>
    %65 = arith.mulf %64, %4 : vector<2x16x128xf32>
    %66 = arith.addf %61, %65 : vector<2x16x128xf32>
    %67 = arith.addf %66, %62 : vector<2x16x128xf32>
    %c1_i32_29 = arith.constant 1 : i32
    %68 = tpu.dynamic_rotate %63 by %c1_i32_29 dim 1 : vector<2x16x128xf32>, i32 -> vector<2x16x128xf32>
    %c15_i32_30 = arith.constant 15 : i32
    %69 = tpu.dynamic_rotate %63 by %c15_i32_30 dim 1 : vector<2x16x128xf32>, i32 -> vector<2x16x128xf32>
    %c1_i32_31 = arith.constant 1 : i32
    %70 = tpu.dynamic_rotate %67 by %c1_i32_31 dim 1 : vector<2x16x128xf32>, i32 -> vector<2x16x128xf32>
    %c15_i32_32 = arith.constant 15 : i32
    %71 = tpu.dynamic_rotate %67 by %c15_i32_32 dim 1 : vector<2x16x128xf32>, i32 -> vector<2x16x128xf32>
    %c0_i32_33 = arith.constant 0 : i32
    %72 = vector.broadcast %c0_i32_33 : i32 to vector<1x16x128xi32>
    %73 = arith.cmpi sgt, %5, %72 : vector<1x16x128xi32>
    %cst_34 = arith.constant 0.000000e+00 : f32
    %74 = vector.shape_cast %73 : vector<1x16x128xi1> to vector<1x16x128xi1>
    %75 = vector.broadcast %74 : vector<1x16x128xi1> to vector<2x16x128xi1>
    %76 = vector.broadcast %cst_34 : f32 to vector<2x16x128xf32>
    %77 = arith.select %75, %68, %76 : vector<2x16x128xi1>, vector<2x16x128xf32>
    %c0_i32_35 = arith.constant 0 : i32
    %78 = vector.broadcast %c0_i32_35 : i32 to vector<1x16x128xi32>
    %79 = arith.cmpi sgt, %5, %78 : vector<1x16x128xi32>
    %cst_36 = arith.constant 0.000000e+00 : f32
    %80 = vector.shape_cast %79 : vector<1x16x128xi1> to vector<1x16x128xi1>
    %81 = vector.broadcast %80 : vector<1x16x128xi1> to vector<2x16x128xi1>
    %82 = vector.broadcast %cst_36 : f32 to vector<2x16x128xf32>
    %83 = arith.select %81, %70, %82 : vector<2x16x128xi1>, vector<2x16x128xf32>
    %c15_i32_37 = arith.constant 15 : i32
    %84 = vector.broadcast %c15_i32_37 : i32 to vector<1x16x128xi32>
    %85 = arith.cmpi slt, %5, %84 : vector<1x16x128xi32>
    %cst_38 = arith.constant 0.000000e+00 : f32
    %86 = vector.shape_cast %85 : vector<1x16x128xi1> to vector<1x16x128xi1>
    %87 = vector.broadcast %86 : vector<1x16x128xi1> to vector<2x16x128xi1>
    %88 = vector.broadcast %cst_38 : f32 to vector<2x16x128xf32>
    %89 = arith.select %87, %69, %88 : vector<2x16x128xi1>, vector<2x16x128xf32>
    %c15_i32_39 = arith.constant 15 : i32
    %90 = vector.broadcast %c15_i32_39 : i32 to vector<1x16x128xi32>
    %91 = arith.cmpi slt, %5, %90 : vector<1x16x128xi32>
    %cst_40 = arith.constant 0.000000e+00 : f32
    %92 = vector.shape_cast %91 : vector<1x16x128xi1> to vector<1x16x128xi1>
    %93 = vector.broadcast %92 : vector<1x16x128xi1> to vector<2x16x128xi1>
    %94 = vector.broadcast %cst_40 : f32 to vector<2x16x128xf32>
    %95 = arith.select %93, %71, %94 : vector<2x16x128xi1>, vector<2x16x128xf32>
    %cst_41 = arith.constant 2.000000e+00 : f32
    %96 = vector.broadcast %cst_41 : f32 to vector<2x16x128xf32>
    %97 = arith.mulf %96, %63 : vector<2x16x128xf32>
    %98 = arith.addf %77, %97 : vector<2x16x128xf32>
    %99 = arith.addf %98, %89 : vector<2x16x128xf32>
    %100 = arith.subf %95, %83 : vector<2x16x128xf32>
    %101 = arith.mulf %99, %99 : vector<2x16x128xf32>
    %102 = arith.mulf %100, %100 : vector<2x16x128xf32>
    %103 = arith.addf %101, %102 : vector<2x16x128xf32>
    %cst_42 = arith.constant 9.99999997E-7 : f32
    %104 = vector.broadcast %cst_42 : f32 to vector<2x16x128xf32>
    %105 = arith.addf %103, %104 : vector<2x16x128xf32>
    %106 = math.sqrt %105 : vector<2x16x128xf32>
    %107 = arith.subf %60, %106 : vector<2x16x128xf32>
    %c16_i32 = arith.constant 16 : i32
    %108 = vector.broadcast %c16_i32 : i32 to vector<1x16x128xi32>
    %109 = arith.cmpi slt, %6, %108 : vector<1x16x128xi32>
    %cst_43 = arith.constant 0.000000e+00 : f32
    %110 = vector.shape_cast %109 : vector<1x16x128xi1> to vector<1x16x128xi1>
    %111 = vector.broadcast %110 : vector<1x16x128xi1> to vector<2x16x128xi1>
    %112 = vector.broadcast %cst_43 : f32 to vector<2x16x128xf32>
    %113 = arith.select %111, %107, %112 : vector<2x16x128xi1>, vector<2x16x128xf32>
    %c0_44 = arith.constant 0 : index
    %c0_45 = arith.constant 0 : index
    %c0_46 = arith.constant 0 : index
    %114 = vector.load %arg5[%c0_44, %c0_45, %c0_46] : memref<1x8x128xf32, #tpu.memory_space<vmem>>, vector<1x8x128xf32>
    %115 = arith.mulf %113, %113 : vector<2x16x128xf32>
    %116 = vector.shape_cast %115 : vector<2x16x128xf32> to vector<4x8x128xf32>
    %cst_47 = arith.constant dense<0.000000e+00> : vector<8x128xf32>
    %117 = vector.multi_reduction <add>, %116, %cst_47 [0] : vector<4x8x128xf32> to vector<8x128xf32>
    %118 = vector.shape_cast %117 : vector<8x128xf32> to vector<1x8x128xf32>
    %119 = arith.addf %114, %118 : vector<1x8x128xf32>
    %c0_48 = arith.constant 0 : index
    %c0_49 = arith.constant 0 : index
    %c0_50 = arith.constant 0 : index
    %120 = vector.load %arg5[%c0_48, %c0_49, %c0_50] : memref<1x8x128xf32, #tpu.memory_space<vmem>>, vector<1x8x128xf32>
    tpu.vector_store %arg5[%c0_48, %c0_49, %c0_50], %119 {strides = array<i32>} : memref<1x8x128xf32, #tpu.memory_space<vmem>>, vector<1x8x128xf32>,
    return
  }
  func.func @transform_0(%arg0: i32, %arg1: i32) -> (i32, i32, i32) {
    %c1_i32 = arith.constant 1 : i32
    %0 = arith.muli %arg0, %c1_i32 : i32
    %1 = arith.addi %0, %arg1 : i32
    %c0_i32 = arith.constant 0 : i32
    %c0_i32_0 = arith.constant 0 : i32
    %c0_i32_1 = arith.constant 0 : i32
    return %1, %c0_i32, %c0_i32_0 : i32, i32, i32
  }
  func.func @transform_1(%arg0: i32, %arg1: i32) -> (i32, i32, i32) {
    %c1_i32 = arith.constant 1 : i32
    %0 = arith.muli %arg0, %c1_i32 : i32
    %1 = arith.addi %0, %arg1 : i32
    %c0_i32 = arith.constant 0 : i32
    %c0_i32_0 = arith.constant 0 : i32
    %c0_i32_1 = arith.constant 0 : i32
    return %1, %c0_i32, %c0_i32_0 : i32, i32, i32
  }
  func.func @transform_2(%arg0: i32, %arg1: i32) -> (i32, i32, i32) {
    %c0_i32 = arith.constant 0 : i32
    %c0_i32_0 = arith.constant 0 : i32
    %c0_i32_1 = arith.constant 0 : i32
    return %arg0, %c0_i32, %c0_i32_0 : i32, i32, i32
  }
  func.func @transform_3(%arg0: i32, %arg1: i32) -> (i32, i32, i32) {
    %c0_i32 = arith.constant 0 : i32
    %c0_i32_0 = arith.constant 0 : i32
    %c0_i32_1 = arith.constant 0 : i32
    return %arg0, %c0_i32, %c0_i32_0 : i32, i32, i32
  }
}

</mosaic_0001>

<bundles_post_ra>
// kernel: tpu_custom_call.1
= control target key start
LH: loop header
LB: loop body
LE: loop exit
PB: predicated region body
PF: predicated region fallthrough
CT: control target
= control target key end

     0   :  { %9 = vsyncpa [#allocation3], 0  ;;  %s842_s0 = inlined_call_operand.hbm [shape: f32[2,16,128], index: 0, kind: input, shape index: {}]   ;;  %s843_s1 = inlined_call_operand.hbm [shape: f32[2,16,128], index: 1, kind: input, shape index: {}]   ;;  %s844_s2 = inlined_call_operand.hbm [shape: f32[1,8,128], index: 2, kind: output, shape index: {0}]   ;;  %s845_s3 = inlined_call_operand.hbm [shape: f32[1,8,128], index: 3, kind: output, shape index: {1}]  }
   0x1   :  { %10 = vsyncpa [#allocation6], 0 }
   0x2   :  { %11 = vsyncpa [#allocation4], 0 }
   0x3   :  { %12 = vsyncpa [#allocation9], 0  ;;  %s556_s12 = smov [#allocation2]   ;;  %s460_s16 = scalar_lea.hbm %s842_s0, 512 }
   0x4   :  { %s23_s13 = sshll.u32 %s556_s12, 4  ;;  %p461_p0 = scmp.ne.s32.totalorder %s842_s0, %s460_s16  ;;  %s24_s13 = int_to_ptr.vmem [resolvable:$true] %s23_s13 }
   0x5   :  { %p464_p1 = scmp.lt.u32.totalorder %s460_s16, %s842_s0 }
   0x7   :  { %p466_p2 = pnand %p464_p1, %p461_p0 }
   0x9   :  { %469 = shalt.err (!%p466_p2)
}
   0xa   :  { %s470_s21 = scalar_lea.vmem %s24_s13, 512  ;;  %p475_p4 = scmp.lt.s32.totalorder %s24_s13, %s24_s13 }
   0xb   :  { %p471_p3 = scmp.ne.s32.totalorder %s24_s13, %s470_s21  ;;  %p476_p5 = scmp.lt.s32.totalorder %s470_s21, %s470_s21 }
   0xd   :  { %p477_p6 = por %p476_p5, %p475_p4 }
   0xf   :  { %p478_p7 = pnand %p477_p6, %p471_p3 }
  0x11   :  { %481 = shalt.err (!%p478_p7)
}
  0x12   :  { %s557_s22 = smov 128   ;;  %s558_s23 = smov 8  }
  0x13   :  { %29 = dma.hbm_to_vmem [thread:$0]  %s842_s0, 512, %s24_s13, [#allocation3], %s557_s22, %s557_s22, %s558_s23  }
  0x14   :  { %s559_s26 = smov [#allocation5]   ;;  %s482_s30 = scalar_lea.hbm %s843_s1, 512 }
  0x15   :  { %s40_s27 = sshll.u32 %s559_s26, 4  ;;  %p483_p8 = scmp.ne.s32.totalorder %s843_s1, %s482_s30  ;;  %s41_s27 = int_to_ptr.vmem [resolvable:$true] %s40_s27 }
  0x16   :  { %p486_p9 = scmp.lt.u32.totalorder %s482_s30, %s843_s1 }
  0x18   :  { %p488_p10 = pnand %p486_p9, %p483_p8 }
  0x1a   :  { %491 = shalt.err (!%p488_p10)
}
  0x1b   :  { %s492_s8 = scalar_lea.vmem %s41_s27, 512  ;;  %p497_p12 = scmp.lt.s32.totalorder %s41_s27, %s41_s27 }
  0x1c   :  { %p493_p11 = scmp.ne.s32.totalorder %s41_s27, %s492_s8  ;;  %p498_p13 = scmp.lt.s32.totalorder %s492_s8, %s492_s8 }
  0x1e   :  { %p499_p0 = por %p498_p13, %p497_p12 }
  0x20   :  { %p500_p1 = pnand %p499_p0, %p493_p11 }
  0x22   :  { %503 = shalt.err (!%p500_p1)
}
  0x23   :  { %46 = dma.hbm_to_vmem [thread:$0]  %s843_s1, 512, %s41_s27, [#allocation6], %s557_s22, %s557_s22, %s558_s23  }
  0x24   :  { %548 = dma.done.wait [#allocation3], 512  }
  0x25   :  { %549 = vsyncadd [#allocation3], 4294966784 }
  0x26   :  { %550 = dma.done.wait [#allocation6], 512  }
  0x27   :  { %551 = vsyncadd [#allocation6], 4294966784  ;;  %v63_v0 = vld [vmem:[#allocation2] sm:$0xff]  ;;  %s560_s10 = smov 1   ;;  %s561_s11 = smov 127   ;;  %v64_v1 = vld [vmem:[#allocation2 + $0x8] sm:$0xff] }
  0x28   :  { %98 = vrot.lane.b32.xlu1 %v63_v0, %s560_s10  ;;  %90 = vrot.lane.b32.xlu0 %v63_v0, %s561_s11  ;;  %v608_v2 = vld [vmem:[#allocation5 + $0x8] sm:$0xff]  ;;  %v610_v3 = vld [vmem:[#allocation5] sm:$0xff]  ;;  %v66_v4 = vld [vmem:[#allocation2 + $0x18] sm:$0xff]  ;;  %s562_s1 = smov [#allocation7]  }
  0x29   :  { %v616_v5 = vld [vmem:[#allocation2 + $0x10] sm:$0xff]  ;;  %v620_v6 = vld [vmem:[#allocation5 + $0x18] sm:$0xff]  ;;  %v77_v8 = vsub.f32 %v64_v1, %v608_v2  ;;  %v76_v9 = vsub.f32 %v63_v0, %v610_v3  ;;  %s411_s12 = sshll.u32 %s562_s1, 4  ;;  %s412_s12 = int_to_ptr.vmem [resolvable:$true] %s411_s12 }
  0x2a   :  { %v622_v7 = vld [vmem:[#allocation5 + $0x10] sm:$0xff]  ;;  %v79_v14 = vsub.f32 %v66_v4, %v620_v6  ;;  %s504_s13 = scalar_lea.vmem %s412_s12, 128  ;;  %p509_p3 = scmp.lt.s32.totalorder %s412_s12, %s412_s12 }
  0x2b   :  { %v82_v10 = vmul.f32 %v77_v8, %v77_v8  ;;  %v81_v11 = vmul.f32 %v76_v9, %v76_v9  ;;  %v78_v12 = vsub.f32 %v616_v5, %v622_v7  ;;  %p505_p2 = scmp.ne.s32.totalorder %s412_s12, %s504_s13  ;;  %p510_p4 = scmp.lt.s32.totalorder %s504_s13, %s504_s13 }
  0x2c   :  { %100 = vrot.lane.b32.xlu1 %v64_v1, %s560_s10  ;;  %92 = vrot.lane.b32.xlu0 %v64_v1, %s561_s11  ;;  %v84_v16 = vmul.f32 %v79_v14, %v79_v14 }
  0x2d   :  { %v85_v13 = vadd.f32 %v82_v10, %v81_v11  ;;  %v83_v15 = vmul.f32 %v78_v12, %v78_v12  ;;  %p511_p5 = por %p510_p4, %p509_p3 }
  0x2f   :  { %v86_v17 = vadd.f32 %v85_v13, %v83_v15  ;;  %p512_p6 = pnand %p511_p5, %p505_p2 }
  0x30   :  { %246 = vrot.lane.b32.xlu1 %v608_v2, %s561_s11  ;;  %244 = vrot.lane.b32.xlu0 %v610_v3, %s561_s11 }
  0x31   :  { %v87_v18 = vadd.f32 %v86_v17, %v84_v16 }
  0x33   :  { %89 = vst [vmem:[#allocation7] sm:$0xff] %v87_v18 }
  0x34   :  { %254 = vrot.lane.b32.xlu1 %v608_v2, %s560_s10  ;;  %252 = vrot.lane.b32.xlu0 %v610_v3, %s560_s10 }
  0x38   :  { %96 = vrot.lane.b32.xlu1 %v66_v4, %s561_s11  ;;  %94 = vrot.lane.b32.xlu0 %v616_v5, %s561_s11 }
  0x3c   :  { %104 = vrot.lane.b32.xlu1 %v66_v4, %s560_s10  ;;  %102 = vrot.lane.b32.xlu0 %v616_v5, %s560_s10 }
  0x40   :  { %250 = vrot.lane.b32.xlu1 %v620_v6, %s561_s11  ;;  %248 = vrot.lane.b32.xlu0 %v622_v7, %s561_s11 }
  0x44   :  { %258 = vrot.lane.b32.xlu1 %v620_v6, %s560_s10  ;;  %256 = vrot.lane.b32.xlu0 %v622_v7, %s560_s10 }
  0x45   :  { %515 = shalt.err (!%p512_p6)
}
  0x46   :  { %s516_s16 = scalar_lea.hbm %s844_s2, 128 }
  0x47   :  { %p517_p7 = scmp.ne.s32.totalorder %s844_s2, %s516_s16  ;;  %p520_p8 = scmp.lt.u32.totalorder %s516_s16, %s844_s2 }
  0x49   :  { %p522_p9 = pnand %p520_p8, %p517_p7 }
  0x4b   :  { %525 = shalt.err (!%p522_p9)
}
  0x4c   :  { %414 = dma.vmem_to_hbm [thread:$0]  %s412_s12, 128, %s844_s2, [#allocation4]   ;;  %v71_v19 = vlaneseq  ;;  %v110_v20 = vmul.f32 2.0, %v63_v0  ;;  %v111_v26 = vmul.f32 2.0, %v64_v1  ;;  %v265_v33 = vmul.f32 2.0, %v608_v2 }
  0x4d   :  { %v264_v36 = vmul.f32 2.0, %v610_v3  ;;  %v657_v37 = vmul.f32 2.0, %v66_v4  ;;  %v660_v47 = vmul.f32 2.0, %v616_v5  ;;  %s563_s2 = smov [#allocation8]  }
  0x4e   :  { %v646_v21 = vshrl.u32 %v71_v19, 7  ;;  %s421_s23 = sshll.u32 %s563_s2, 4  ;;  %s422_s23 = int_to_ptr.vmem [resolvable:$true] %s421_s23 }
  0x4f   :  { %s526_s24 = scalar_lea.vmem %s422_s23, 128  ;;  %p531_p11 = scmp.lt.s32.totalorder %s422_s23, %s422_s23 }
  0x50   :  { %v649_v25 = vadd.s32 8, %v646_v21  ;;  %vm126_vm0 = vcmp.lt.s32.totalorder %v646_v21, 1  ;;  %vm135_vm1 = vcmp.lt.s32.totalorder %v646_v21, 7  ;;  %vm156_vm2 = vcmp.gt.s32.totalorder %v646_v21, 0  ;;  %p527_p10 = scmp.ne.s32.totalorder %s422_s23, %s526_s24  ;;  %p532_p12 = scmp.lt.s32.totalorder %s526_s24, %s526_s24 }
  0x51   :  { %v788_v21 = vand.u32 127, %v71_v19 }
  0x52   :  { %vm171_vm3 = vcmp.lt.s32.totalorder %v649_v25, 15  ;;  %p533_p13 = por %p532_p12, %p531_p11 }
  0x53   :  { %vm388_vm12 = vcmp.lt.s32.totalorder %v788_v21, 16 }
  0x54   :  { %p534_p0 = pnand %p533_p13, %p527_p10 }
  0x9a   :  { %v99_v22 = vpop.permute.xlu1 %98  ;;  %v91_v23 = vpop.permute.xlu0 %90 }
  0x9b   :  { %v114_v24 = vadd.f32 %v110_v20, %v91_v23  ;;  %v106_v27 = vsub.f32 %v91_v23, %v99_v22 }
  0x9d   :  { %v118_v28 = vadd.f32 %v114_v24, %v99_v22  ;;  %v122_v34 = vrot.slane %v106_v27, 7  ;;  %v131_v35 = vrot.slane %v106_v27, 1  ;;  %v184_v44 = vmul.f32 2.0, %v106_v27 }
  0x9e   :  { %v101_v29 = vpop.permute.xlu1 %100  ;;  %v93_v30 = vpop.permute.xlu0 %92 }
  0x9f   :  { %v107_v31 = vsub.f32 %v93_v30, %v101_v29  ;;  %v115_v32 = vadd.f32 %v111_v26, %v93_v30  ;;  %v140_v42 = vrot.slane %v118_v28, 7  ;;  %v148_v43 = vrot.slane %v118_v28, 1 }
  0xa0   :  { %v687_v28 = vmul.f32 2.0, %v620_v6 }
  0xa1   :  { %v119_v38 = vadd.f32 %v115_v32, %v101_v29  ;;  %v124_v39 = vrot.slane %v107_v31, 7  ;;  %v133_v40 = vrot.slane %v107_v31, 1  ;;  %v185_v41 = vmul.f32 2.0, %v107_v31 }
  0xa2   :  { %v247_v45 = vpop.permute.xlu1 %246  ;;  %v245_v46 = vpop.permute.xlu0 %244 }
  0xa3   :  { %v127_v48 = vsel %vm126_vm0, %v122_v34, %v124_v39  ;;  %v129_v49 = vsel %vm126_vm0, %v124_v39, %v122_v34  ;;  %v136_v50 = vsel %vm135_vm1, %v131_v35, %v133_v40  ;;  %v138_v51 = vsel %vm135_vm1, %v133_v40, %v131_v35 }
  0xa4   :  { %v142_v52 = vrot.slane %v119_v38, 7  ;;  %v150_v53 = vrot.slane %v119_v38, 1  ;;  %v162_v54 = vsel %vm156_vm2, %v129_v49, 0.0  ;;  %v177_v55 = vsel %vm171_vm3, %v138_v51, 0.0 }
  0xa5   :  { %v188_v56 = vadd.f32 %v184_v44, %v162_v54  ;;  %v189_v57 = vadd.f32 %v185_v41, %v127_v48  ;;  %v269_v58 = vadd.f32 %v265_v33, %v247_v45  ;;  %v268_v59 = vadd.f32 %v264_v36, %v245_v46 }
  0xa6   :  { %v144_v60 = vsel %vm126_vm0, %v140_v42, %v142_v52  ;;  %v146_v61 = vsel %vm126_vm0, %v142_v52, %v140_v42  ;;  %v152_v62 = vsel %vm135_vm1, %v148_v43, %v150_v53  ;;  %v154_v63 = vsel %vm135_vm1, %v150_v53, %v148_v43  ;;  %v255_v0 = vpop.permute.xlu1 %254  ;;  %v253_v1 = vpop.permute.xlu0 %252 }
  0xa7   :  { %v166_v2 = vsel %vm156_vm2, %v146_v61, 0.0  ;;  %v181_v3 = vsel %vm171_vm3, %v154_v63, 0.0  ;;  %v192_v4 = vadd.f32 %v188_v56, %v136_v50  ;;  %v193_v5 = vadd.f32 %v189_v57, %v177_v55 }
  0xa8   :  { %v196_v8 = vsub.f32 %v152_v62, %v166_v2  ;;  %v197_v9 = vsub.f32 %v181_v3, %v144_v60  ;;  %v261_v10 = vsub.f32 %v247_v45, %v255_v0  ;;  %v273_v11 = vadd.f32 %v269_v58, %v255_v0 }
  0xa9   :  { %v200_v12 = vmul.f32 %v192_v4, %v192_v4  ;;  %v201_v13 = vmul.f32 %v193_v5, %v193_v5  ;;  %v260_v14 = vsub.f32 %v245_v46, %v253_v1  ;;  %v272_v15 = vadd.f32 %v268_v59, %v253_v1 }
  0xaa   :  { %v204_v16 = vmul.f32 %v196_v8, %v196_v8  ;;  %v205_v17 = vmul.f32 %v197_v9, %v197_v9  ;;  %v278_v18 = vrot.slane %v261_v10, 7  ;;  %v286_v20 = vrot.slane %v261_v10, 1  ;;  %v97_v22 = vpop.permute.xlu1 %96  ;;  %v95_v23 = vpop.permute.xlu0 %94 }
  0xab   :  { %v294_v24 = vrot.slane %v273_v11, 7  ;;  %v302_v26 = vrot.slane %v273_v11, 1  ;;  %v276_v27 = vrot.slane %v260_v14, 7  ;;  %v284_v31 = vrot.slane %v260_v14, 1 }
  0xac   :  { %v208_v29 = vadd.f32 %v204_v16, %v200_v12  ;;  %v209_v30 = vadd.f32 %v205_v17, %v201_v13  ;;  %v292_v32 = vrot.slane %v272_v15, 7  ;;  %v325_v33 = vmul.f32 2.0, %v261_v10 }
  0xad   :  { %v282_v34 = vsel %vm126_vm0, %v278_v18, %v276_v27  ;;  %v300_v35 = vrot.slane %v272_v15, 1  ;;  %v692_v36 = vmul.f32 2.0, %v622_v7  ;;  %v280_v39 = vsel %vm126_vm0, %v276_v27, %v278_v18 }
  0xae   :  { %v694_v38 = vadd.f32 1e-06, %v208_v29  ;;  %v290_v6 = vsel %vm135_vm1, %v286_v20, %v284_v31  ;;  %v324_v40 = vmul.f32 2.0, %v260_v14  ;;  %v296_v41 = vsel %vm126_vm0, %v292_v32, %v294_v24  ;;  %v105_v44 = vpop.permute.xlu1 %104  ;;  %v103_v45 = vpop.permute.xlu0 %102 }
  0xaf   :  { %v298_v42 = vsel %vm126_vm0, %v294_v24, %v292_v32  ;;  %v304_v43 = vsel %vm135_vm1, %v300_v35, %v302_v26  ;;  %v306_v7 = vsel %vm135_vm1, %v302_v26, %v300_v35  ;;  %v708_v46 = vadd.f32 1e-06, %v209_v30 }
  0xb0   :  { %v308_v48 = vsel %vm156_vm2, %v282_v34, 0.0  ;;  %v312_v49 = vsel %vm156_vm2, %v298_v42, 0.0  ;;  %v317_v50 = vsel %vm171_vm3, %v290_v6, 0.0  ;;  %v288_v51 = vsel %vm135_vm1, %v284_v31, %v286_v20 }
  0xb1   :  { %v321_v52 = vsel %vm171_vm3, %v306_v7, 0.0  ;;  %v328_v53 = vadd.f32 %v324_v40, %v308_v48  ;;  %v329_v54 = vadd.f32 %v325_v33, %v280_v39  ;;  %v336_v55 = vsub.f32 %v304_v43, %v312_v49 }
  0xb2   :  { %v337_v56 = vsub.f32 %v321_v52, %v296_v41  ;;  %v117_v57 = vadd.f32 %v657_v37, %v97_v22  ;;  %v116_v58 = vadd.f32 %v660_v47, %v95_v23  ;;  %v109_v61 = vsub.f32 %v97_v22, %v105_v44  ;;  %v251_v9 = vpop.permute.xlu1 %250  ;;  %v249_v10 = vpop.permute.xlu0 %248 }
  0xb3   :  { %v332_v59 = vadd.f32 %v328_v53, %v288_v51  ;;  %v333_v60 = vadd.f32 %v329_v54, %v317_v50  ;;  %v108_v62 = vsub.f32 %v95_v23, %v103_v45  ;;  %v344_v63 = vmul.f32 %v336_v55, %v336_v55 }
  0xb4   :  { %v345_v0 = vmul.f32 %v337_v56, %v337_v56  ;;  %v121_v1 = vadd.f32 %v117_v57, %v105_v44  ;;  %v120_v2 = vadd.f32 %v116_v58, %v103_v45  ;;  %v125_v5 = vrot.slane %v109_v61, 7 }
  0xb5   :  { %v340_v3 = vmul.f32 %v332_v59, %v332_v59  ;;  %v341_v4 = vmul.f32 %v333_v60, %v333_v60  ;;  %v134_v8 = vrot.slane %v109_v61, 1  ;;  %444 = vrsqrt.f32 %v694_v38 }
  0xb6   :  { %v143_v11 = vrot.slane %v121_v1, 7  ;;  %v151_v37 = vrot.slane %v121_v1, 1  ;;  %v123_v12 = vrot.slane %v108_v62, 7  ;;  %v132_v14 = vrot.slane %v108_v62, 1  ;;  %v259_v35 = vpop.permute.xlu1 %258  ;;  %v257_v39 = vpop.permute.xlu0 %256 }
  0xb7   :  { %v348_v47 = vadd.f32 %v344_v63, %v340_v3  ;;  %v349_v13 = vadd.f32 %v345_v0, %v341_v4  ;;  %v141_v15 = vrot.slane %v120_v2, 7  ;;  %446 = vrsqrt.f32 %v708_v46 }
  0xb8   :  { %v187_v16 = vmul.f32 2.0, %v109_v61  ;;  %v130_v17 = vsel %vm126_vm0, %v125_v5, %v123_v12  ;;  %v149_v18 = vrot.slane %v120_v2, 1  ;;  %v128_v22 = vsel %vm126_vm0, %v123_v12, %v125_v5 }
  0xb9   :  { %v726_v20 = vadd.f32 1e-06, %v348_v47  ;;  %v139_v23 = vsel %vm135_vm1, %v134_v8, %v132_v14  ;;  %v186_v24 = vmul.f32 2.0, %v108_v62  ;;  %v145_v26 = vsel %vm126_vm0, %v141_v15, %v143_v11 }
  0xba   :  { %v147_v27 = vsel %vm126_vm0, %v143_v11, %v141_v15  ;;  %v153_v29 = vsel %vm135_vm1, %v149_v18, %v151_v37  ;;  %v155_v30 = vsel %vm135_vm1, %v151_v37, %v149_v18  ;;  %v740_v31 = vadd.f32 1e-06, %v349_v13 }
  0xbb   :  { %v164_v32 = vsel %vm156_vm2, %v130_v17, 0.0  ;;  %v168_v33 = vsel %vm156_vm2, %v147_v27, 0.0  ;;  %v179_v34 = vsel %vm171_vm3, %v139_v23, 0.0  ;;  %v137_v6 = vsel %vm135_vm1, %v132_v14, %v134_v8 }
  0xbc   :  { %v183_v40 = vsel %vm171_vm3, %v155_v30, 0.0  ;;  %v190_v41 = vadd.f32 %v186_v24, %v164_v32  ;;  %v191_v42 = vadd.f32 %v187_v16, %v128_v22  ;;  %v198_v43 = vsub.f32 %v153_v29, %v168_v33 }
  0xbd   :  { %v199_v7 = vsub.f32 %v183_v40, %v145_v26  ;;  %v271_v44 = vadd.f32 %v687_v28, %v251_v9  ;;  %v270_v45 = vadd.f32 %v692_v36, %v249_v10  ;;  %v263_v50 = vsub.f32 %v251_v9, %v259_v35 }
  0xbe   :  { %v194_v48 = vadd.f32 %v190_v41, %v137_v6  ;;  %v195_v49 = vadd.f32 %v191_v42, %v179_v34  ;;  %v262_v51 = vsub.f32 %v249_v10, %v257_v39  ;;  %448 = vrsqrt.f32 %v726_v20 }
  0xbf   :  { %v207_v52 = vmul.f32 %v199_v7, %v199_v7  ;;  %v275_v53 = vadd.f32 %v271_v44, %v259_v35  ;;  %v274_v54 = vadd.f32 %v270_v45, %v257_v39  ;;  %v445_v55 = vpop.eup %444  ;;  %v279_v58 = vrot.slane %v263_v50, 7 }
  0xc0   :  { %v202_v56 = vmul.f32 %v194_v48, %v194_v48  ;;  %v203_v57 = vmul.f32 %v195_v49, %v195_v49  ;;  %v287_v59 = vrot.slane %v263_v50, 1  ;;  %v206_v60 = vmul.f32 %v198_v43, %v198_v43 }
  0xc1   :  { %v295_v61 = vrot.slane %v275_v53, 7  ;;  %v303_v62 = vrot.slane %v275_v53, 1  ;;  %v277_v28 = vrot.slane %v262_v51, 7  ;;  %v447_v63 = vpop.eup %446  ;;  %450 = vrsqrt.f32 %v740_v31 }
  0xc2   :  { %v285_v36 = vrot.slane %v262_v51, 1  ;;  %v293_v0 = vrot.slane %v274_v54, 7  ;;  %v210_v1 = vadd.f32 %v206_v60, %v202_v56  ;;  %v327_v2 = vmul.f32 2.0, %v263_v50 }
  0xc3   :  { %v283_v3 = vsel %vm126_vm0, %v279_v58, %v277_v28  ;;  %v301_v4 = vrot.slane %v274_v54, 1  ;;  %v211_v5 = vadd.f32 %v207_v52, %v203_v57  ;;  %v281_v8 = vsel %vm126_vm0, %v277_v28, %v279_v58 }
  0xc4   :  { %v291_v9 = vsel %vm135_vm1, %v287_v59, %v285_v36  ;;  %v326_v10 = vmul.f32 2.0, %v262_v51  ;;  %v297_v11 = vsel %vm126_vm0, %v293_v0, %v295_v61  ;;  %v299_v37 = vsel %vm126_vm0, %v295_v61, %v293_v0 }
  0xc5   :  { %v305_v12 = vsel %vm135_vm1, %v301_v4, %v303_v62  ;;  %v307_v47 = vsel %vm135_vm1, %v303_v62, %v301_v4  ;;  %v310_v13 = vsel %vm156_vm2, %v283_v3, 0.0  ;;  %v314_v14 = vsel %vm156_vm2, %v299_v37, 0.0 }
  0xc6   :  { %v319_v15 = vsel %vm171_vm3, %v291_v9, 0.0  ;;  %v776_v16 = vadd.f32 1e-06, %v210_v1  ;;  %v323_v17 = vsel %vm171_vm3, %v307_v47, 0.0  ;;  %v330_v18 = vadd.f32 %v326_v10, %v310_v13 }
  0xc7   :  { %v331_v22 = vadd.f32 %v327_v2, %v281_v8  ;;  %v780_v23 = vadd.f32 1e-06, %v211_v5  ;;  %v289_v24 = vsel %vm135_vm1, %v285_v36, %v287_v59  ;;  %v338_v26 = vsub.f32 %v305_v12, %v314_v14 }
  0xc8   :  { %v339_v27 = vsub.f32 %v323_v17, %v297_v11  ;;  %v449_v29 = vpop.eup %448  ;;  %v334_v30 = vadd.f32 %v330_v18, %v289_v24  ;;  %452 = vrsqrt.f32 %v776_v16  ;;  %v217_v6 = vmul.f32 %v445_v55, %v694_v38 }
  0xc9   :  { %v335_v32 = vadd.f32 %v331_v22, %v319_v15  ;;  %v346_v39 = vmul.f32 %v338_v26, %v338_v26  ;;  %454 = vrsqrt.f32 %v780_v23  ;;  %v224_v42 = vmul.f32 %v447_v63, %v708_v46 }
  0xca   :  { %v347_v33 = vmul.f32 %v339_v27, %v339_v27  ;;  %v342_v34 = vmul.f32 %v334_v30, %v334_v30  ;;  %vm218_vm4 = vcmp.eq.f32.partialorder %v694_v38, inf  ;;  %v357_v44 = vmul.f32 %v449_v29, %v726_v20 }
  0xcb   :  { %v343_v35 = vmul.f32 %v335_v32, %v335_v32  ;;  %v451_v25 = vpop.eup %450  ;;  %v219_v45 = vsel %vm218_vm4, %v694_v38, %v217_v6  ;;  %vm225_vm5 = vcmp.eq.f32.partialorder %v708_v46, inf  ;;  %vm358_vm6 = vcmp.eq.f32.partialorder %v726_v20, inf }
  0xcc   :  { %v350_v40 = vadd.f32 %v346_v39, %v342_v34  ;;  %v364_v48 = vmul.f32 %v451_v25, %v740_v31  ;;  %v359_v19 = vsel %vm358_vm6, %v726_v20, %v357_v44  ;;  %v361_v49 = vand.u32 2147483648, %v726_v20 }
  0xcd   :  { %v351_v41 = vadd.f32 %v347_v33, %v343_v35  ;;  %vm365_vm7 = vcmp.eq.f32.partialorder %v740_v31, inf  ;;  %v226_v50 = vsel %vm225_vm5, %v708_v46, %v224_v42  ;;  %vm360_vm8 = vcmp.eq.f32.partialorder %v726_v20, 0.0 }
  0xce   :  { %v354_v43 = vadd.f32 1e-06, %v350_v40  ;;  %v366_v51 = vsel %vm365_vm7, %v740_v31, %v364_v48  ;;  %v221_v52 = vand.u32 2147483648, %v694_v38  ;;  %v228_v53 = vand.u32 2147483648, %v708_v46 }
  0xcf   :  { %v355_v7 = vadd.f32 1e-06, %v351_v41  ;;  %v362_v54 = vsel %vm360_vm8, %v361_v49, %v359_v19  ;;  %v368_v55 = vand.u32 2147483648, %v740_v31  ;;  %vm220_vm9 = vcmp.eq.f32.partialorder %v694_v38, 0.0 }
  0xd0   :  { %456 = vrsqrt.f32 %v354_v43  ;;  %vm227_vm10 = vcmp.eq.f32.partialorder %v708_v46, 0.0  ;;  %vm367_vm11 = vcmp.eq.f32.partialorder %v740_v31, 0.0  ;;  %v222_v57 = vsel %vm220_vm9, %v221_v52, %v219_v45 }
  0xd1   :  { %458 = vrsqrt.f32 %v355_v7  ;;  %v229_v58 = vsel %vm227_vm10, %v228_v53, %v226_v50  ;;  %v369_v59 = vsel %vm367_vm11, %v368_v55, %v366_v51  ;;  %v384_v60 = vsub.f32 %v222_v57, %v362_v54 }
  0xd2   :  { %v453_v56 = vpop.eup %452  ;;  %v385_v61 = vsub.f32 %v229_v58, %v369_v59  ;;  %vm232_vm13 = vcmp.eq.f32.partialorder %v776_v16, inf  ;;  %vm234_vm14 = vcmp.eq.f32.partialorder %v776_v16, 0.0  ;;  %v235_v0 = vand.u32 2147483648, %v776_v16 }
  0xd3   :  { %v455_v20 = vpop.eup %454  ;;  %v231_v62 = vmul.f32 %v453_v56, %v776_v16  ;;  %v391_v28 = vsel %vm388_vm12, %v384_v60, 0.0  ;;  %vm239_vm15 = vcmp.eq.f32.partialorder %v780_v23, inf  ;;  %vm241_vm0 = vcmp.eq.f32.partialorder %v780_v23, 0.0 }
  0xd4   :  { %v392_v38 = vsel %vm388_vm12, %v385_v61, 0.0  ;;  %v238_v46 = vmul.f32 %v455_v20, %v780_v23  ;;  %v396_v31 = vmul.f32 %v391_v28, %v391_v28  ;;  %v242_v4 = vand.u32 2147483648, %v780_v23 }
  0xd5   :  { %v397_v63 = vmul.f32 %v392_v38, %v392_v38  ;;  %v233_v3 = vsel %vm232_vm13, %v776_v16, %v231_v62  ;;  %vm372_vm1 = vcmp.eq.f32.partialorder %v354_v43, inf  ;;  %v375_v9 = vand.u32 2147483648, %v354_v43 }
  0xd6   :  { %v240_v8 = vsel %vm239_vm15, %v780_v23, %v238_v46  ;;  %vm374_vm2 = vcmp.eq.f32.partialorder %v354_v43, 0.0  ;;  %vm379_vm3 = vcmp.eq.f32.partialorder %v355_v7, inf  ;;  %v382_v37 = vand.u32 2147483648, %v355_v7 }
  0xd7   :  { %v400_v1 = vadd.f32 %v397_v63, %v396_v31  ;;  %v236_v12 = vsel %vm234_vm14, %v235_v0, %v233_v3  ;;  %vm381_vm4 = vcmp.eq.f32.partialorder %v355_v7, 0.0  ;;  %v243_v14 = vsel %vm241_vm0, %v242_v4, %v240_v8 }
  0xda   :  { %v457_v36 = vpop.eup %456 }
  0xdb   :  { %v459_v2 = vpop.eup %458  ;;  %v371_v5 = vmul.f32 %v457_v36, %v354_v43 }
  0xdc   :  { %v378_v10 = vmul.f32 %v459_v2, %v355_v7 }
  0xdd   :  { %v373_v11 = vsel %vm372_vm1, %v354_v43, %v371_v5 }
  0xde   :  { %v376_v47 = vsel %vm374_vm2, %v375_v9, %v373_v11  ;;  %v380_v13 = vsel %vm379_vm3, %v355_v7, %v378_v10 }
  0xdf   :  { %v383_v15 = vsel %vm381_vm4, %v382_v37, %v380_v13  ;;  %v386_v17 = vsub.f32 %v236_v12, %v376_v47 }
  0xe0   :  { %v387_v18 = vsub.f32 %v243_v14, %v383_v15 }
  0xe1   :  { %v393_v22 = vsel %vm388_vm12, %v386_v17, 0.0 }
  0xe2   :  { %v394_v23 = vsel %vm388_vm12, %v387_v18, 0.0  ;;  %v398_v24 = vmul.f32 %v393_v22, %v393_v22 }
  0xe3   :  { %v399_v26 = vmul.f32 %v394_v23, %v394_v23 }
  0xe4   :  { %v401_v27 = vadd.f32 %v400_v1, %v398_v24 }
  0xe6   :  { %v402_v16 = vadd.f32 %v401_v27, %v399_v26 }
  0xe8   :  { %404 = vst [vmem:[#allocation8] sm:$0xff] %v402_v16 }
  0xe9   :  { %537 = shalt.err (!%p534_p0)
}
  0xea   :  { %s538_s27 = scalar_lea.hbm %s845_s3, 128 }
  0xeb   :  { %p539_p1 = scmp.ne.s32.totalorder %s845_s3, %s538_s27  ;;  %p542_p2 = scmp.lt.u32.totalorder %s538_s27, %s845_s3 }
  0xed   :  { %p544_p3 = pnand %p542_p2, %p539_p1 }
  0xef   :  { %547 = shalt.err (!%p544_p3)
}
  0xf0   :  { %424 = dma.vmem_to_hbm [thread:$0]  %s422_s23, 128, %s845_s3, [#allocation9]  }
  0xf1   :  { %552 = dma.done.wait [#allocation4], 128  }
  0xf2   :  { %553 = vsyncadd [#allocation4], 4294967168 }
  0xf3   :  { %554 = dma.done.wait [#allocation9], 128  }
  0xf4   :  { %555 = vsyncadd [#allocation9], 4294967168 }
  0xf5   :  { %431 = vsyncpa [#allocation3], 1 }
  0xf6   :  { %432 = vsyncpa [#allocation6], 1 }
  0xf7   :  { %433 = vsyncpa [#allocation4], 1 }
  0xf8   :  { %434 = vsyncpa [#allocation9], 1 }

</bundles_post_ra>
